<compile_context>
chip_gen: v7x
topology: tpu7x:2x2x1
jax: 0.10.0
libtpu: 0.0.40
codegen_flags: <defaults>
</compile_context>

<pallas_src>
import functools

import jax
import jax.numpy as jnp
from jax.experimental import pallas as pl
from jax.experimental.pallas import tpu as pltpu

HIDDEN = 256
LANE = 128
QOUT = 8          # narrow output: lane 0 = q1, lane 1 = q2, rest zero
MAX_TM = 1024     # max batch-tile rows (VMEM footprint stays < ~8 MiB)


def _round_up(x, m):
    return ((x + m - 1) // m) * m


def _critic_kernel(sa_ref, w14_ref, w2_ref, w5_ref, w3_ref, w6_ref, b_ref, q_ref):
    # sa_ref:  (TM, Dp)      bf16  [state | action | 1 | 0-pad]  (Dp = 128)
    # w14_ref: (Dp, 512)     bf16  [w1 | w4], with [b1 | b4] folded into row D
    # w2_ref:  (256, 256)    bf16
    # w5_ref:  (256, 256)    bf16
    # w3_ref:  (256, 8)      bf16  w3 in lane 0
    # w6_ref:  (256, 8)      bf16  w6 in lane 1
    # b_ref:   (3, 256)      f32   row0 = b2, row1 = b5, row2[0:2] = [b3, b6]
    # q_ref:   (TM, 8)       f32   q1 in lane 0, q2 in lane 1
    sa = sa_ref[...]

    # Layer 1, both branches fused (b1/b4 ride in on the constant-1 lane).
    z = jnp.dot(sa, w14_ref[...], preferred_element_type=jnp.float32)
    z = jnp.maximum(z.astype(jnp.bfloat16), 0)            # bf16 ReLU  (TM, 512)

    b2 = b_ref[0:1, :]                                     # (1, 256) f32
    b5 = b_ref[1:2, :]
    b36 = b_ref[2:3, 0:QOUT]                               # (1, 8) f32: [b3, b6, 0..]

    # Layer 2, per branch: f32 bias-add + ReLU, bf16 inputs to the MXU.
    h = jnp.dot(z[:, :HIDDEN], w2_ref[...], preferred_element_type=jnp.float32) + b2
    g = jnp.dot(z[:, HIDDEN:], w5_ref[...], preferred_element_type=jnp.float32) + b5
    hr = jnp.maximum(h, 0.0).astype(jnp.bfloat16)
    gr = jnp.maximum(g, 0.0).astype(jnp.bfloat16)

    # Layer 3: two K=256 matmuls into the narrow (TM, 8) output (no lane concat).
    q = jnp.dot(hr, w3_ref[...], preferred_element_type=jnp.float32)
    q = q + jnp.dot(gr, w6_ref[...], preferred_element_type=jnp.float32)
    q_ref[...] = q + b36


def init_critic_params(key, state_dim, action_dim):
    """Raw params, torch.nn.Linear-style init, stored as [in_features, out_features]."""
    D = state_dim + action_dim
    sizes = [(D, HIDDEN), (HIDDEN, HIDDEN), (HIDDEN, 1),
             (D, HIDDEN), (HIDDEN, HIDDEN), (HIDDEN, 1)]
    params = []
    for (fan_in, fan_out) in sizes:
        key, kw, kb = jax.random.split(key, 3)
        bound = 1.0 / jnp.sqrt(fan_in)
        w = jax.random.uniform(kw, (fan_in, fan_out), jnp.float32, -bound, bound)
        b = jax.random.uniform(kb, (fan_out,), jnp.float32, -bound, bound)
        params += [w, b]
    return tuple(params)


def pack_critic_params(params, state_dim, action_dim):
    """One-time repack into the padded bf16 kernel layout (outside the hot path)."""
    (w1, b1, w2, b2, w3, b3, w4, b4, w5, b5, w6, b6) = params
    D = state_dim + action_dim
    Dp = _round_up(D + 1, LANE)  # +1 lane holds the constant 1 (folds b1/b4)

    w14 = jnp.zeros((Dp, 2 * HIDDEN), jnp.float32)
    w14 = w14.at[:D, :HIDDEN].set(w1).at[:D, HIDDEN:].set(w4)
    w14 = w14.at[D, :HIDDEN].set(b1).at[D, HIDDEN:].set(b4)

    w3p = jnp.zeros((HIDDEN, QOUT), jnp.float32).at[:, 0].set(w3[:, 0])
    w6p = jnp.zeros((HIDDEN, QOUT), jnp.float32).at[:, 1].set(w6[:, 0])

    bias = jnp.zeros((3, HIDDEN), jnp.float32)
    bias = bias.at[0, :].set(b2).at[1, :].set(b5)
    bias = bias.at[2, 0].set(b3[0]).at[2, 1].set(b6[0])

    return (w14.astype(jnp.bfloat16),
            w2.astype(jnp.bfloat16),
            w5.astype(jnp.bfloat16),
            w3p.astype(jnp.bfloat16),
            w6p.astype(jnp.bfloat16),
            bias)


@jax.jit
def critic_forward(state, action, packed):
    """Returns (q1, q2), each of shape [batch, 1], matching Critic.forward."""
    w14, w2, w5, w3p, w6p, bias = packed
    B = state.shape[0]
    D = state.shape[1] + action.shape[1]
    Dp = w14.shape[0]

    # Batch tile: multiple of 16 (bf16 packed sublanes).  For large batches cap
    # TM so the grid has >= 2 steps (v7x megacore sharding); small batches use
    # a single ragged tile.
    if B <= 512:
        TM = _round_up(B, 16)
    else:
        TM = min(MAX_TM, _round_up(pl.cdiv(B, 2), 256))
    grid = pl.cdiv(B, TM)

    # Single fused assembly of sa (no zeros-buffer + scatter, no batch padding):
    # [state | action | 1 | 0-pad], cast to bf16 for the MXU.
    pieces = [state.astype(jnp.bfloat16),
              action.astype(jnp.bfloat16),
              jnp.ones((B, 1), jnp.bfloat16)]
    if Dp - D - 1 > 0:
        pieces.append(jnp.zeros((B, Dp - D - 1), jnp.bfloat16))
    sa = jnp.concatenate(pieces, axis=1)                    # (B, Dp) bf16

    rows = grid * TM
    flops = 2 * rows * (Dp * 2 * HIDDEN + 2 * HIDDEN * HIDDEN + 2 * HIDDEN * QOUT)
    bytes_accessed = (B * Dp * 2 + w14.size * 2 + w2.size * 2 + w5.size * 2
                      + w3p.size * 2 + w6p.size * 2 + bias.size * 4 + B * QOUT * 4)

    q = pl.pallas_call(
        _critic_kernel,
        out_shape=jax.ShapeDtypeStruct((B, QOUT), jnp.float32),
        grid_spec=pltpu.PrefetchScalarGridSpec(
            num_scalar_prefetch=0,
            grid=(grid,),
            in_specs=[
                pl.BlockSpec((TM, Dp), lambda i: (i, 0)),            # batch tile
                pl.BlockSpec((Dp, 2 * HIDDEN), lambda i: (0, 0)),    # resident weights
                pl.BlockSpec((HIDDEN, HIDDEN), lambda i: (0, 0)),
                pl.BlockSpec((HIDDEN, HIDDEN), lambda i: (0, 0)),
                pl.BlockSpec((HIDDEN, QOUT), lambda i: (0, 0)),
                pl.BlockSpec((HIDDEN, QOUT), lambda i: (0, 0)),
                pl.BlockSpec((3, HIDDEN), lambda i: (0, 0)),
            ],
            out_specs=pl.BlockSpec((TM, QOUT), lambda i: (i, 0)),
        ),
        compiler_params=pltpu.CompilerParams(
            dimension_semantics=("parallel",),
            vmem_limit_bytes=32 * 1024 * 1024,
        ),
        cost_estimate=pl.CostEstimate(
            flops=flops, transcendentals=0, bytes_accessed=bytes_accessed),
    )(sa, w14, w2, w5, w3p, w6p, bias)

    return q[:, 0:1], q[:, 1:2]


def _reference_forward(state, action, params):
    (w1, b1, w2, b2, w3, b3, w4, b4, w5, b5, w6, b6) = params
    sa = jnp.concatenate([state, action], axis=1)
    h = jax.nn.relu(sa @ w1 + b1)
    h = jax.nn.relu(h @ w2 + b2)
    q1 = h @ w3 + b3
    g = jax.nn.relu(sa @ w4 + b4)
    g = jax.nn.relu(g @ w5 + b5)
    q2 = g @ w6 + b6
    return q1, q2


if __name__ == "__main__":
    # LunarLanderContinuous-v2: state_dim=8, action_dim=2; small batch.
    state_dim, action_dim, batch = 8, 2, 2

    key = jax.random.PRNGKey(0)
    kp, ks, ka = jax.random.split(key, 3)
    raw_params = init_critic_params(kp, state_dim, action_dim)
    packed_params = pack_critic_params(raw_params, state_dim, action_dim)
    packed_params = jax.tree_util.tree_map(jax.block_until_ready, packed_params)

    state = jax.random.normal(ks, (batch, state_dim), jnp.float32)
    action = jax.random.normal(ka, (batch, action_dim), jnp.float32)

    q1, q2 = critic_forward(state, action, packed_params)
    jax.block_until_ready((q1, q2))

    r1, r2 = _reference_forward(state, action, raw_params)
    assert q1.shape == (batch, 1) and q2.shape == (batch, 1)
    # bf16 MXU inputs with f32 accumulation -> relaxed tolerance vs f32 reference.
    assert jnp.allclose(q1, r1, atol=5e-2, rtol=5e-2)
    assert jnp.allclose(q2, r2, atol=5e-2, rtol=5e-2)

    print("KERNEL_OK")
</pallas_src>

<mosaic_0001>
module attributes {stable_mosaic.version = 11 : i64} {
  func.func @_critic_kernel(%arg0: i32, %arg1: memref<16x128xbf16, #tpu.memory_space<vmem>>, %arg2: memref<128x512xbf16, #tpu.memory_space<vmem>>, %arg3: memref<256x256xbf16, #tpu.memory_space<vmem>>, %arg4: memref<256x256xbf16, #tpu.memory_space<vmem>>, %arg5: memref<256x8xbf16, #tpu.memory_space<vmem>>, %arg6: memref<256x8xbf16, #tpu.memory_space<vmem>>, %arg7: memref<3x256xf32, #tpu.memory_space<vmem>>, %arg8: memref<16x8xf32, #tpu.memory_space<vmem>>) attributes {dimension_semantics = [#tpu.dimension_semantics<parallel>], iteration_bounds = array<i64: 1>, scalar_prefetch = 0 : i64, scratch_operands = 0 : i64, tpu.core_type = #tpu.core_type<tc>, window_params = [{transform_indices = @transform_0, window_bounds = array<i64: 16, 128>}, {pipeline_mode = #tpu.pipeline_mode<synchronous>, transform_indices = @transform_1, window_bounds = array<i64: 128, 512>}, {pipeline_mode = #tpu.pipeline_mode<synchronous>, transform_indices = @transform_2, window_bounds = array<i64: 256, 256>}, {pipeline_mode = #tpu.pipeline_mode<synchronous>, transform_indices = @transform_3, window_bounds = array<i64: 256, 256>}, {pipeline_mode = #tpu.pipeline_mode<synchronous>, transform_indices = @transform_4, window_bounds = array<i64: 256, 8>}, {pipeline_mode = #tpu.pipeline_mode<synchronous>, transform_indices = @transform_5, window_bounds = array<i64: 256, 8>}, {pipeline_mode = #tpu.pipeline_mode<synchronous>, transform_indices = @transform_6, window_bounds = array<i64: 3, 256>}, {transform_indices = @transform_7, window_bounds = array<i64: 16, 8>}]} {
    %c0 = arith.constant 0 : index
    %c0_0 = arith.constant 0 : index
    %0 = vector.load %arg1[%c0, %c0_0] : memref<16x128xbf16, #tpu.memory_space<vmem>>, vector<16x128xbf16>
    %c0_1 = arith.constant 0 : index
    %c0_2 = arith.constant 0 : index
    %1 = vector.load %arg2[%c0_1, %c0_2] : memref<128x512xbf16, #tpu.memory_space<vmem>>, vector<128x512xbf16>
    %cst = arith.constant dense<0.000000e+00> : vector<16x512xf32>
    %2 = tpu.matmul %0, %1, %cst {dimension_numbers = #tpu.dot_dimension_numbers<[1], [0], [0], [1], [0, 0, 1, 1], [], []>} : vector<16x128xbf16>, vector<128x512xbf16>, vector<16x512xf32> -> vector<16x512xf32>
    %3 = arith.truncf %2 : vector<16x512xf32> to vector<16x512xbf16>
    %cst_3 = arith.constant 0.000000e+00 : bf16
    %4 = vector.broadcast %cst_3 : bf16 to vector<16x512xbf16>
    %5 = arith.maximumf %3, %4 : vector<16x512xbf16>
    %c0_4 = arith.constant 0 : index
    %c0_5 = arith.constant 0 : index
    %6 = vector.load %arg7[%c0_4, %c0_5] : memref<3x256xf32, #tpu.memory_space<vmem>>, vector<1x256xf32>
    %c1 = arith.constant 1 : index
    %c0_6 = arith.constant 0 : index
    %7 = vector.load %arg7[%c1, %c0_6] : memref<3x256xf32, #tpu.memory_space<vmem>>, vector<1x256xf32>
    %c2 = arith.constant 2 : index
    %c0_7 = arith.constant 0 : index
    %8 = vector.load %arg7[%c2, %c0_7] : memref<3x256xf32, #tpu.memory_space<vmem>>, vector<1x8xf32>
    %9 = vector.extract_strided_slice %5 {offsets = [0, 0], sizes = [16, 256], strides = [1, 1]} : vector<16x512xbf16> to vector<16x256xbf16>
    %c0_8 = arith.constant 0 : index
    %c0_9 = arith.constant 0 : index
    %10 = vector.load %arg3[%c0_8, %c0_9] : memref<256x256xbf16, #tpu.memory_space<vmem>>, vector<256x256xbf16>
    %cst_10 = arith.constant dense<0.000000e+00> : vector<16x256xf32>
    %11 = tpu.matmul %9, %10, %cst_10 {dimension_numbers = #tpu.dot_dimension_numbers<[1], [0], [0], [1], [0, 0, 1, 1], [], []>} : vector<16x256xbf16>, vector<256x256xbf16>, vector<16x256xf32> -> vector<16x256xf32>
    %12 = vector.broadcast %6 : vector<1x256xf32> to vector<16x256xf32>
    %13 = arith.addf %11, %12 : vector<16x256xf32>
    %14 = vector.extract_strided_slice %5 {offsets = [0, 256], sizes = [16, 256], strides = [1, 1]} : vector<16x512xbf16> to vector<16x256xbf16>
    %c0_11 = arith.constant 0 : index
    %c0_12 = arith.constant 0 : index
    %15 = vector.load %arg4[%c0_11, %c0_12] : memref<256x256xbf16, #tpu.memory_space<vmem>>, vector<256x256xbf16>
    %cst_13 = arith.constant dense<0.000000e+00> : vector<16x256xf32>
    %16 = tpu.matmul %14, %15, %cst_13 {dimension_numbers = #tpu.dot_dimension_numbers<[1], [0], [0], [1], [0, 0, 1, 1], [], []>} : vector<16x256xbf16>, vector<256x256xbf16>, vector<16x256xf32> -> vector<16x256xf32>
    %17 = vector.broadcast %7 : vector<1x256xf32> to vector<16x256xf32>
    %18 = arith.addf %16, %17 : vector<16x256xf32>
    %cst_14 = arith.constant 0.000000e+00 : f32
    %19 = vector.broadcast %cst_14 : f32 to vector<16x256xf32>
    %20 = arith.maximumf %13, %19 : vector<16x256xf32>
    %21 = arith.truncf %20 : vector<16x256xf32> to vector<16x256xbf16>
    %cst_15 = arith.constant 0.000000e+00 : f32
    %22 = vector.broadcast %cst_15 : f32 to vector<16x256xf32>
    %23 = arith.maximumf %18, %22 : vector<16x256xf32>
    %24 = arith.truncf %23 : vector<16x256xf32> to vector<16x256xbf16>
    %c0_16 = arith.constant 0 : index
    %c0_17 = arith.constant 0 : index
    %25 = vector.load %arg5[%c0_16, %c0_17] : memref<256x8xbf16, #tpu.memory_space<vmem>>, vector<256x8xbf16>
    %cst_18 = arith.constant dense<0.000000e+00> : vector<16x8xf32>
    %26 = tpu.matmul %21, %25, %cst_18 {dimension_numbers = #tpu.dot_dimension_numbers<[1], [0], [0], [1], [0, 0, 1, 1], [], []>} : vector<16x256xbf16>, vector<256x8xbf16>, vector<16x8xf32> -> vector<16x8xf32>
    %c0_19 = arith.constant 0 : index
    %c0_20 = arith.constant 0 : index
    %27 = vector.load %arg6[%c0_19, %c0_20] : memref<256x8xbf16, #tpu.memory_space<vmem>>, vector<256x8xbf16>
    %cst_21 = arith.constant dense<0.000000e+00> : vector<16x8xf32>
    %28 = tpu.matmul %24, %27, %cst_21 {dimension_numbers = #tpu.dot_dimension_numbers<[1], [0], [0], [1], [0, 0, 1, 1], [], []>} : vector<16x256xbf16>, vector<256x8xbf16>, vector<16x8xf32> -> vector<16x8xf32>
    %29 = arith.addf %26, %28 : vector<16x8xf32>
    %30 = vector.broadcast %8 : vector<1x8xf32> to vector<16x8xf32>
    %31 = arith.addf %29, %30 : vector<16x8xf32>
    %c0_22 = arith.constant 0 : index
    %c0_23 = arith.constant 0 : index
    %32 = vector.load %arg8[%c0_22, %c0_23] : memref<16x8xf32, #tpu.memory_space<vmem>>, vector<16x8xf32>
    tpu.vector_store %arg8[%c0_22, %c0_23], %31 {strides = array<i32>} : memref<16x8xf32, #tpu.memory_space<vmem>>, vector<16x8xf32>,
    return
  }
  func.func @transform_0(%arg0: i32) -> (i32, i32) {
    %c0_i32 = arith.constant 0 : i32
    %c0_i32_0 = arith.constant 0 : i32
    return %arg0, %c0_i32 : i32, i32
  }
  func.func @transform_1(%arg0: i32) -> (i32, i32) {
    %c0_i32 = arith.constant 0 : i32
    %c0_i32_0 = arith.constant 0 : i32
    %c0_i32_1 = arith.constant 0 : i32
    return %c0_i32, %c0_i32_0 : i32, i32
  }
  func.func @transform_2(%arg0: i32) -> (i32, i32) {
    %c0_i32 = arith.constant 0 : i32
    %c0_i32_0 = arith.constant 0 : i32
    %c0_i32_1 = arith.constant 0 : i32
    return %c0_i32, %c0_i32_0 : i32, i32
  }
  func.func @transform_3(%arg0: i32) -> (i32, i32) {
    %c0_i32 = arith.constant 0 : i32
    %c0_i32_0 = arith.constant 0 : i32
    %c0_i32_1 = arith.constant 0 : i32
    return %c0_i32, %c0_i32_0 : i32, i32
  }
  func.func @transform_4(%arg0: i32) -> (i32, i32) {
    %c0_i32 = arith.constant 0 : i32
    %c0_i32_0 = arith.constant 0 : i32
    %c0_i32_1 = arith.constant 0 : i32
    return %c0_i32, %c0_i32_0 : i32, i32
  }
  func.func @transform_5(%arg0: i32) -> (i32, i32) {
    %c0_i32 = arith.constant 0 : i32
    %c0_i32_0 = arith.constant 0 : i32
    %c0_i32_1 = arith.constant 0 : i32
    return %c0_i32, %c0_i32_0 : i32, i32
  }
  func.func @transform_6(%arg0: i32) -> (i32, i32) {
    %c0_i32 = arith.constant 0 : i32
    %c0_i32_0 = arith.constant 0 : i32
    %c0_i32_1 = arith.constant 0 : i32
    return %c0_i32, %c0_i32_0 : i32, i32
  }
  func.func @transform_7(%arg0: i32) -> (i32, i32) {
    %c0_i32 = arith.constant 0 : i32
    %c0_i32_0 = arith.constant 0 : i32
    return %arg0, %c0_i32 : i32, i32
  }
}

</mosaic_0001>

<bundles_post_ra>
// kernel: critic_forward.1
= control target key start
LH: loop header
LB: loop body
LE: loop exit
PB: predicated region body
PF: predicated region fallthrough
CT: control target
= control target key end

     0   :  { %12 = vsyncpa [#allocation3], 0  ;;  %s2016_s0 = inlined_call_operand.vmem [shape: bf16[2,128], index: 0, kind: input, shape index: {}]   ;;  %s2017_s1 = inlined_call_operand.vmem [shape: bf16[128,512], index: 1, kind: input, shape index: {}]   ;;  %s2018_s2 = inlined_call_operand.hbm [shape: bf16[256,256], index: 2, kind: input, shape index: {}]   ;;  %s2019_s3 = inlined_call_operand.hbm [shape: bf16[256,256], index: 3, kind: input, shape index: {}]   ;;  %s2020_s4 = inlined_call_operand.vmem [shape: bf16[256,8], index: 4, kind: input, shape index: {}]   ;;  %s2021_s5 = inlined_call_operand.vmem [shape: bf16[256,8], index: 5, kind: input, shape index: {}]   ;;  %s2022_s6 = inlined_call_operand.vmem [shape: f32[3,256], index: 6, kind: input, shape index: {}]   ;;  %s2023_s7 = inlined_call_operand.vmem [shape: f32[2,8], index: 7, kind: output, shape index: {}]  }
   0x1   :  { %13 = vsyncpa [#allocation5], 0  ;;  %s1707_s24 = smov [#allocation2]   ;;  %s1659_s28 = scalar_lea.hbm %s2018_s2, 4096 }
   0x2   :  { %s23_s25 = sshll.u32 %s1707_s24, 4  ;;  %p1660_p0 = scmp.ne.s32.totalorder %s2018_s2, %s1659_s28  ;;  %s24_s25 = int_to_ptr.vmem [resolvable:$true] %s23_s25 }
   0x3   :  { %p1663_p1 = scmp.lt.u32.totalorder %s1659_s28, %s2018_s2 }
   0x5   :  { %p1665_p2 = pnand %p1663_p1, %p1660_p0 }
   0x7   :  { %1668 = shalt.err (!%p1665_p2)
}
   0x8   :  { %s1669_s10 = scalar_lea.vmem %s24_s25, 4096  ;;  %p1674_p4 = scmp.lt.s32.totalorder %s24_s25, %s24_s25 }
   0x9   :  { %p1670_p3 = scmp.ne.s32.totalorder %s24_s25, %s1669_s10  ;;  %p1675_p5 = scmp.lt.s32.totalorder %s1669_s10, %s1669_s10 }
   0xb   :  { %p1676_p6 = por %p1675_p5, %p1674_p4 }
   0xd   :  { %p1677_p7 = pnand %p1676_p6, %p1670_p3 }
   0xf   :  { %1680 = shalt.err (!%p1677_p7)
}
  0x10   :  { %s1708_s11 = smov 128   ;;  %s1709_s12 = smov 8  }
  0x11   :  { %29 = dma.hbm_to_vmem [thread:$0]  %s2018_s2, 4096, %s24_s25, [#allocation3], %s1708_s11, %s1708_s11, %s1709_s12  }
  0x12   :  { %s1710_s15 = smov [#allocation4]   ;;  %s1681_s19 = scalar_lea.hbm %s2019_s3, 4096 }
  0x13   :  { %s35_s16 = sshll.u32 %s1710_s15, 4  ;;  %p1682_p8 = scmp.ne.s32.totalorder %s2019_s3, %s1681_s19  ;;  %s36_s16 = int_to_ptr.vmem [resolvable:$true] %s35_s16 }
  0x14   :  { %p1685_p9 = scmp.lt.u32.totalorder %s1681_s19, %s2019_s3 }
  0x16   :  { %p1687_p10 = pnand %p1685_p9, %p1682_p8 }
  0x18   :  { %1690 = shalt.err (!%p1687_p10)
}
  0x19   :  { %s1691_s24 = scalar_lea.vmem %s36_s16, 4096  ;;  %p1696_p12 = scmp.lt.s32.totalorder %s36_s16, %s36_s16 }
  0x1a   :  { %p1692_p11 = scmp.ne.s32.totalorder %s36_s16, %s1691_s24  ;;  %p1697_p13 = scmp.lt.s32.totalorder %s1691_s24, %s1691_s24 }
  0x1c   :  { %p1698_p0 = por %p1697_p13, %p1696_p12 }
  0x1e   :  { %p1699_p1 = pnand %p1698_p0, %p1692_p11 }
  0x20   :  { %1702 = shalt.err (!%p1699_p1)
}
  0x21   :  { %41 = dma.hbm_to_vmem [thread:$0]  %s2019_s3, 4096, %s36_s16, [#allocation5], %s1708_s11, %s1708_s11, %s1709_s12  }
  0x22   :  { %1703 = dma.done.wait [#allocation3], 4096  }
  0x23   :  { %1704 = vsyncadd [#allocation3], 4294963200 }
  0x24   :  { %1705 = dma.done.wait [#allocation5], 4096  }
  0x25   :  { %1706 = vsyncadd [#allocation5], 4294963200  ;;  %v1711_v0 = vmov 0   ;;  %v1483_v1 = vld [vmem:[%s2017_s1 + $0x4] ss:$16 sps:$4 sm:$0xff]   ;;  %v110_v20 = vlaneseq  ;;  %vm1259_vm0 = vcmask 64512  }
  0x26   :  { %345 = vmatprep.mubr.bf16.mxu0 %v1711_v0  ;;  %388 = vmatprep.mubr.bf16.mxu1 %v1711_v0  ;;  %v1485_v2 = vld [vmem:[%s2017_s1 + $0xc] ss:$16 sps:$4 sm:$0xff]   ;;  %v1487_v3 = vld [vmem:[%s2017_s1] ss:$16 sps:$4 sm:$0xff]   ;;  %v1488_v4 = vld [vmem:[%s2017_s1 + $0x8] ss:$16 sps:$4 sm:$0xff]  }
  0x27   :  { %313 = vmatprep.subr.bf16.mxu0 %v1483_v1  ;;  %356 = vmatprep.subr.bf16.mxu1 %v1485_v2  ;;  %v1489_v5 = vld [vmem:[%s2017_s1 + $0x24] ss:$16 sps:$4 sm:$0xff]   ;;  %v1491_v6 = vld [vmem:[%s2017_s1 + $0x2c] ss:$16 sps:$4 sm:$0xff]   ;;  %v1493_v7 = vld [vmem:[%s2017_s1 + $0x20] ss:$16 sps:$4 sm:$0xff]  }
  0x28   :  { %314 = vmatpush1.bf16.msra.mxu0 %v1487_v3  ;;  %357 = vmatpush1.bf16.msra.mxu1 %v1488_v4  ;;  %v1494_v8 = vld [vmem:[%s2017_s1 + $0x28] ss:$16 sps:$4 sm:$0xff]   ;;  %v1495_v9 = vld [vmem:[%s2017_s1 + $0x44] ss:$16 sps:$4 sm:$0xff]   ;;  %v1497_v10 = vld [vmem:[%s2017_s1 + $0x4c] ss:$16 sps:$4 sm:$0xff]  }
  0x29   :  { %315 = vmatprep.subr.bf16.mxu0 %v1489_v5  ;;  %358 = vmatprep.subr.bf16.mxu1 %v1491_v6  ;;  %v1499_v11 = vld [vmem:[%s2017_s1 + $0x40] ss:$16 sps:$4 sm:$0xff]   ;;  %v1500_v12 = vld [vmem:[%s2017_s1 + $0x48] ss:$16 sps:$4 sm:$0xff]   ;;  %v1501_v13 = vld [vmem:[%s2017_s1 + $0x64] ss:$16 sps:$4 sm:$0xff]  }
  0x2a   :  { %v1503_v14 = vld [vmem:[%s2017_s1 + $0x6c] ss:$16 sps:$4 sm:$0xff]   ;;  %v1505_v15 = vld [vmem:[%s2017_s1 + $0x60] ss:$16 sps:$4 sm:$0xff]   ;;  %v1506_v16 = vld [vmem:[%s2017_s1 + $0x68] ss:$16 sps:$4 sm:$0xff]  }
  0x2b   :  { %v1507_v17 = vld [vmem:[%s2017_s1 + $0x84] ss:$16 sps:$4 sm:$0xff]   ;;  %v1712_v18 = vmov 1966171168   ;;  %v1509_v21 = vld [vmem:[%s2017_s1 + $0x8c] ss:$16 sps:$4 sm:$0xff]  }
  0x2c   :  { %316 = vmatpush1.bf16.msra.mxu0 %v1493_v7  ;;  %359 = vmatpush1.bf16.msra.mxu1 %v1494_v8  ;;  %v108_v19 = vunpack.c.l.s4 %v1712_v18  ;;  %v1511_v22 = vld [vmem:[%s2017_s1 + $0x80] ss:$16 sps:$4 sm:$0xff]   ;;  %v1512_v23 = vld [vmem:[%s2017_s1 + $0x88] ss:$16 sps:$4 sm:$0xff]   ;;  %v1513_v24 = vld [vmem:[%s2017_s1 + $0xa4] ss:$16 sps:$4 sm:$0xff]  }
  0x2d   :  { %317 = vmatprep.subr.bf16.mxu0 %v1495_v9  ;;  %360 = vmatprep.subr.bf16.mxu1 %v1497_v10  ;;  %v1842_v26 = vshrl.u32 %v110_v20, 7  ;;  %v1515_v27 = vld [vmem:[%s2017_s1 + $0xac] ss:$16 sps:$4 sm:$0xff]   ;;  %v1517_v28 = vld [vmem:[%s2017_s1 + $0xa0] ss:$16 sps:$4 sm:$0xff]  }
  0x2e   :  { %v109_v25 = vunpack.c.0.s8 %v108_v19  ;;  %v1518_v29 = vld [vmem:[%s2017_s1 + $0xa8] ss:$16 sps:$4 sm:$0xff]   ;;  %v1519_v30 = vld [vmem:[%s2017_s1 + $0xc4] ss:$16 sps:$4 sm:$0xff]   ;;  %v1521_v32 = vld [vmem:[%s2017_s1 + $0xcc] ss:$16 sps:$4 sm:$0xff]  }
  0x2f   :  { %v55_v33 = vld [vmem:[%s2016_s0] sm:$0x1]  ;;  %v56_v34 = vld [vmem:[%s2016_s0 + $0x1] sm:$0x1]  ;;  %v1524_v36 = vld [vmem:[%s2017_s1 + $0xc8] ss:$16 sps:$4 sm:$0xff]  }
  0x30   :  { %318 = vmatpush1.bf16.msra.mxu0 %v1499_v11  ;;  %361 = vmatpush1.bf16.msra.mxu1 %v1500_v12  ;;  %v112_v31 = vsub.s32 %v109_v25, %v1842_v26  ;;  %v1523_v35 = vld [vmem:[%s2017_s1 + $0xc0] ss:$16 sps:$4 sm:$0xff]   ;;  %v59_v39 = vld [vmem:[%s2016_s0 + $0x4] sm:$0x1]  ;;  %v103_v40 = vcombine.low %v55_v33, %v56_v34  ;;  %v60_v41 = vld [vmem:[%s2016_s0 + $0x5] sm:$0x1] }
  0x31   :  { %319 = vmatprep.subr.bf16.mxu0 %v1501_v13  ;;  %362 = vmatprep.subr.bf16.mxu1 %v1503_v14  ;;  %v57_v37 = vld [vmem:[%s2016_s0 + $0x2] sm:$0x1]  ;;  %v58_v38 = vld [vmem:[%s2016_s0 + $0x3] sm:$0x1]  ;;  %v61_v42 = vld [vmem:[%s2016_s0 + $0x6] sm:$0x1]  ;;  %v105_v46 = vcombine.low %v59_v39, %v60_v41 }
  0x32   :  { %v62_v43 = vld [vmem:[%s2016_s0 + $0x7] sm:$0x1]  ;;  %v104_v44 = vcombine.low %v57_v37, %v58_v38  ;;  %v113_v48 = vrot.slane %v103_v40, %v112_v31  ;;  %v1527_v49 = vld [vmem:[%s2017_s1 + $0xec] ss:$16 sps:$4 sm:$0xff]   ;;  %v1529_v53 = vld [vmem:[%s2017_s1 + $0xe0] ss:$16 sps:$4 sm:$0xff]  }
  0x33   :  { %v1525_v45 = vld [vmem:[%s2017_s1 + $0xe4] ss:$16 sps:$4 sm:$0xff]   ;;  %v106_v47 = vcombine.low %v61_v42, %v62_v43  ;;  %v127_v51 = vrot.slane %v105_v46, %v112_v31  ;;  %v1530_v54 = vld [vmem:[%s2017_s1 + $0xe8] ss:$16 sps:$4 sm:$0xff]  }
  0x34   :  { %320 = vmatpush1.bf16.msra.mxu0 %v1505_v15  ;;  %363 = vmatpush1.bf16.msra.mxu1 %v1506_v16  ;;  %v120_v50 = vrot.slane %v104_v44, %v112_v31  ;;  %v1533_v57 = vld [vmem:[#allocation2 + $0x4] ss:$8 sps:$4 sm:$0xff]   ;;  %v1531_v61 = vld [vmem:[#allocation2] ss:$8 sps:$4 sm:$0xff]   ;;  %v1539_v1 = vld [vmem:[#allocation2 + $0x14] ss:$8 sps:$4 sm:$0xff]  }
  0x35   :  { %321 = vmatprep.subr.bf16.mxu0 %v1507_v17  ;;  %364 = vmatprep.subr.bf16.mxu1 %v1509_v21  ;;  %v134_v52 = vrot.slane %v106_v47, %v112_v31  ;;  %v1536_v59 = vld [vmem:[#allocation4 + $0x4] ss:$8 sps:$4 sm:$0xff]   ;;  %v1534_v62 = vld [vmem:[#allocation4] ss:$8 sps:$4 sm:$0xff]   ;;  %v1542_v2 = vld [vmem:[#allocation4 + $0x14] ss:$8 sps:$4 sm:$0xff]  }
  0x36   :  { %v135_v55 = vcombine.low %v113_v48, %v120_v50  ;;  %v1537_v3 = vld [vmem:[#allocation2 + $0x10] ss:$8 sps:$4 sm:$0xff]   ;;  %v1545_v5 = vld [vmem:[#allocation2 + $0x24] ss:$8 sps:$4 sm:$0xff]   ;;  %v1543_v7 = vld [vmem:[#allocation2 + $0x20] ss:$8 sps:$4 sm:$0xff]  }
  0x37   :  { %v136_v56 = vcombine.low %v127_v51, %v134_v52  ;;  %v1540_v4 = vld [vmem:[#allocation4 + $0x10] ss:$8 sps:$4 sm:$0xff]   ;;  %v1548_v6 = vld [vmem:[#allocation4 + $0x24] ss:$8 sps:$4 sm:$0xff]   ;;  %v1546_v8 = vld [vmem:[#allocation4 + $0x20] ss:$8 sps:$4 sm:$0xff]  }
  0x38   :  { %322 = vmatpush1.bf16.msra.mxu0 %v1511_v22  ;;  %365 = vmatpush1.bf16.msra.mxu1 %v1512_v23  ;;  %v143_v58 = vrot.slane %v135_v55, %v112_v31  ;;  %v1551_v9 = vld [vmem:[#allocation2 + $0x34] ss:$8 sps:$4 sm:$0xff]   ;;  %v1549_v11 = vld [vmem:[#allocation2 + $0x30] ss:$8 sps:$4 sm:$0xff]   ;;  %v1557_v13 = vld [vmem:[#allocation2 + $0x44] ss:$8 sps:$4 sm:$0xff]  }
  0x39   :  { %323 = vmatprep.subr.bf16.mxu0 %v1513_v24  ;;  %366 = vmatprep.subr.bf16.mxu1 %v1515_v27  ;;  %v150_v60 = vrot.slane %v136_v56, %v112_v31  ;;  %v1554_v10 = vld [vmem:[#allocation4 + $0x34] ss:$8 sps:$4 sm:$0xff]   ;;  %v1552_v12 = vld [vmem:[#allocation4 + $0x30] ss:$8 sps:$4 sm:$0xff]   ;;  %v1560_v14 = vld [vmem:[#allocation4 + $0x44] ss:$8 sps:$4 sm:$0xff]  }
  0x3a   :  { %v1555_v15 = vld [vmem:[#allocation2 + $0x40] ss:$8 sps:$4 sm:$0xff]   ;;  %v1563_v17 = vld [vmem:[#allocation2 + $0x54] ss:$8 sps:$4 sm:$0xff]   ;;  %v1561_v19 = vld [vmem:[#allocation2 + $0x50] ss:$8 sps:$4 sm:$0xff]  }
  0x3b   :  { %v151_v63 = vcombine.low %v143_v58, %v150_v60  ;;  %v1558_v16 = vld [vmem:[#allocation4 + $0x40] ss:$8 sps:$4 sm:$0xff]   ;;  %v1566_v18 = vld [vmem:[#allocation4 + $0x54] ss:$8 sps:$4 sm:$0xff]   ;;  %v1564_v20 = vld [vmem:[#allocation4 + $0x50] ss:$8 sps:$4 sm:$0xff]  }
  0x3c   :  { %324 = vmatpush1.bf16.msra.mxu0 %v1517_v28  ;;  %367 = vmatpush1.bf16.msra.mxu1 %v1518_v29  ;;  %v1569_v21 = vld [vmem:[#allocation2 + $0x64] ss:$8 sps:$4 sm:$0xff]   ;;  %v1567_v23 = vld [vmem:[#allocation2 + $0x60] ss:$8 sps:$4 sm:$0xff]   ;;  %v1575_v25 = vld [vmem:[#allocation2 + $0x74] ss:$8 sps:$4 sm:$0xff]  }
  0x3d   :  { %325 = vmatprep.subr.bf16.mxu0 %v1519_v30  ;;  %368 = vmatprep.subr.bf16.mxu1 %v1521_v32  ;;  %v1572_v22 = vld [vmem:[#allocation4 + $0x64] ss:$8 sps:$4 sm:$0xff]   ;;  %v1570_v24 = vld [vmem:[#allocation4 + $0x60] ss:$8 sps:$4 sm:$0xff]   ;;  %v1578_v27 = vld [vmem:[#allocation4 + $0x74] ss:$8 sps:$4 sm:$0xff]  }
  0x3e   :  { %v1573_v28 = vld [vmem:[#allocation2 + $0x70] ss:$8 sps:$4 sm:$0xff]   ;;  %v1581_v30 = vld [vmem:[#allocation2 + $0x84] ss:$8 sps:$4 sm:$0xff]   ;;  %v1579_v32 = vld [vmem:[#allocation2 + $0x80] ss:$8 sps:$4 sm:$0xff]  }
  0x3f   :  { %v1576_v29 = vld [vmem:[#allocation4 + $0x70] ss:$8 sps:$4 sm:$0xff]   ;;  %v1584_v31 = vld [vmem:[#allocation4 + $0x84] ss:$8 sps:$4 sm:$0xff]   ;;  %v1582_v33 = vld [vmem:[#allocation4 + $0x80] ss:$8 sps:$4 sm:$0xff]  }
  0x40   :  { %326 = vmatpush1.bf16.msra.mxu0 %v1523_v35  ;;  %369 = vmatpush1.bf16.msra.mxu1 %v1524_v36  ;;  %v1587_v34 = vld [vmem:[#allocation2 + $0x94] ss:$8 sps:$4 sm:$0xff]   ;;  %v1585_v36 = vld [vmem:[#allocation2 + $0x90] ss:$8 sps:$4 sm:$0xff]   ;;  %v1593_v38 = vld [vmem:[#allocation2 + $0xa4] ss:$8 sps:$4 sm:$0xff]  }
  0x41   :  { %327 = vmatprep.subr.bf16.mxu0 %v1525_v45  ;;  %370 = vmatprep.subr.bf16.mxu1 %v1527_v49  ;;  %v1590_v35 = vld [vmem:[#allocation4 + $0x94] ss:$8 sps:$4 sm:$0xff]   ;;  %v1588_v37 = vld [vmem:[#allocation4 + $0x90] ss:$8 sps:$4 sm:$0xff]   ;;  %v1596_v39 = vld [vmem:[#allocation4 + $0xa4] ss:$8 sps:$4 sm:$0xff]  }
  0x42   :  { %v1591_v40 = vld [vmem:[#allocation2 + $0xa0] ss:$8 sps:$4 sm:$0xff]   ;;  %v1599_v42 = vld [vmem:[#allocation2 + $0xb4] ss:$8 sps:$4 sm:$0xff]   ;;  %v1597_v44 = vld [vmem:[#allocation2 + $0xb0] ss:$8 sps:$4 sm:$0xff]  }
  0x43   :  { %v1594_v41 = vld [vmem:[#allocation4 + $0xa0] ss:$8 sps:$4 sm:$0xff]   ;;  %v1602_v43 = vld [vmem:[#allocation4 + $0xb4] ss:$8 sps:$4 sm:$0xff]   ;;  %v1600_v45 = vld [vmem:[#allocation4 + $0xb0] ss:$8 sps:$4 sm:$0xff]  }
  0x44   :  { %328 = vmatpush1.bf16.msra.mxu0 %v1529_v53  ;;  %371 = vmatpush1.bf16.msra.mxu1 %v1530_v54  ;;  %v1605_v46 = vld [vmem:[#allocation2 + $0xc4] ss:$8 sps:$4 sm:$0xff]   ;;  %v1603_v48 = vld [vmem:[#allocation2 + $0xc0] ss:$8 sps:$4 sm:$0xff]   ;;  %v1611_v50 = vld [vmem:[#allocation2 + $0xd4] ss:$8 sps:$4 sm:$0xff]  }
  0x45   :  { %614 = vmatprep.subr.bf16.mxu0 %v1533_v57  ;;  %860 = vmatprep.subr.bf16.mxu1 %v1536_v59  ;;  %v1608_v47 = vld [vmem:[#allocation4 + $0xc4] ss:$8 sps:$4 sm:$0xff]   ;;  %v1606_v49 = vld [vmem:[#allocation4 + $0xc0] ss:$8 sps:$4 sm:$0xff]   ;;  %v1614_v51 = vld [vmem:[#allocation4 + $0xd4] ss:$8 sps:$4 sm:$0xff]  }
  0x46   :  { %v1609_v52 = vld [vmem:[#allocation2 + $0xd0] ss:$8 sps:$4 sm:$0xff]   ;;  %v1617_v54 = vld [vmem:[#allocation2 + $0xe4] ss:$8 sps:$4 sm:$0xff]   ;;  %v1615_v56 = vld [vmem:[#allocation2 + $0xe0] ss:$8 sps:$4 sm:$0xff]  }
  0x47   :  { %346 = vmatmul.mubr.bf16.vlgmr.msra.gmra.mrb[0].mxu0 %v151_v63  ;;  %389 = vmatmul.mubr.bf16.vlgmr.msra.gmra.mrb[0].mxu1 %v151_v63  ;;  %v1612_v53 = vld [vmem:[#allocation4 + $0xd0] ss:$8 sps:$4 sm:$0xff]   ;;  %v1620_v55 = vld [vmem:[#allocation4 + $0xe4] ss:$8 sps:$4 sm:$0xff]   ;;  %v1618_v57 = vld [vmem:[#allocation4 + $0xe0] ss:$8 sps:$4 sm:$0xff]  }
  0x48   :  { %615 = vmatpush1.bf16.msra.mxu0 %v1531_v61  ;;  %861 = vmatpush1.bf16.msra.mxu1 %v1534_v62  ;;  %v1623_v58 = vld [vmem:[#allocation2 + $0xf4] ss:$8 sps:$4 sm:$0xff]   ;;  %v1621_v60 = vld [vmem:[#allocation2 + $0xf0] ss:$8 sps:$4 sm:$0xff]   ;;  %v1627_v62 = vld [vmem:[%s2021_s5 + $0x40] sm:$0xff]  }
  0x49   :  { %616 = vmatprep.subr.bf16.mxu0 %v1539_v1  ;;  %862 = vmatprep.subr.bf16.mxu1 %v1542_v2  ;;  %v1626_v59 = vld [vmem:[#allocation4 + $0xf4] ss:$8 sps:$4 sm:$0xff]   ;;  %v1624_v61 = vld [vmem:[#allocation4 + $0xf0] ss:$8 sps:$4 sm:$0xff]   ;;  %v1628_v63 = vld [vmem:[%s2020_s4 + $0x40] sm:$0xff]  }
  0x4c   :  { %617 = vmatpush1.bf16.msra.mxu0 %v1537_v3  ;;  %863 = vmatpush1.bf16.msra.mxu1 %v1540_v4 }
  0x4d   :  { %618 = vmatprep.subr.bf16.mxu0 %v1545_v5  ;;  %864 = vmatprep.subr.bf16.mxu1 %v1548_v6 }
  0x50   :  { %619 = vmatpush1.bf16.msra.mxu0 %v1543_v7  ;;  %865 = vmatpush1.bf16.msra.mxu1 %v1546_v8 }
  0x51   :  { %620 = vmatprep.subr.bf16.mxu0 %v1551_v9  ;;  %866 = vmatprep.subr.bf16.mxu1 %v1554_v10 }
  0x54   :  { %621 = vmatpush1.bf16.msra.mxu0 %v1549_v11  ;;  %867 = vmatpush1.bf16.msra.mxu1 %v1552_v12 }
  0x55   :  { %622 = vmatprep.subr.bf16.mxu0 %v1557_v13  ;;  %868 = vmatprep.subr.bf16.mxu1 %v1560_v14 }
  0x58   :  { %623 = vmatpush1.bf16.msra.mxu0 %v1555_v15  ;;  %869 = vmatpush1.bf16.msra.mxu1 %v1558_v16  ;;  %v1629_v15 = vld [vmem:[%s2021_s5] sm:$0xff]  }
  0x59   :  { %624 = vmatprep.subr.bf16.mxu0 %v1563_v17  ;;  %870 = vmatprep.subr.bf16.mxu1 %v1566_v18  ;;  %v1630_v16 = vld [vmem:[%s2020_s4] sm:$0xff]  }
  0x5c   :  { %625 = vmatpush1.bf16.msra.mxu0 %v1561_v19  ;;  %871 = vmatpush1.bf16.msra.mxu1 %v1564_v20  ;;  %v1631_v19 = vld [vmem:[%s2021_s5 + $0x48] sm:$0xff]  }
  0x5d   :  { %626 = vmatprep.subr.bf16.mxu0 %v1569_v21  ;;  %872 = vmatprep.subr.bf16.mxu1 %v1572_v22  ;;  %v1632_v20 = vld [vmem:[%s2020_s4 + $0x48] sm:$0xff]   ;;  %v1635_v22 = vld [vmem:[%s2021_s5 + $0x50] sm:$0xff]  }
  0x5e   :  { %v1633_v21 = vld [vmem:[%s2021_s5 + $0x8] sm:$0xff]  }
  0x60   :  { %627 = vmatpush1.bf16.msra.mxu0 %v1567_v23  ;;  %873 = vmatpush1.bf16.msra.mxu1 %v1570_v24  ;;  %v1636_v23 = vld [vmem:[%s2020_s4 + $0x50] sm:$0xff]  }
  0x61   :  { %628 = vmatprep.subr.bf16.mxu0 %v1575_v25  ;;  %874 = vmatprep.subr.bf16.mxu1 %v1578_v27  ;;  %v1637_v24 = vld [vmem:[%s2021_s5 + $0x10] sm:$0xff]   ;;  %v1639_v27 = vld [vmem:[%s2021_s5 + $0x58] sm:$0xff]  }
  0x62   :  { %v1638_v25 = vld [vmem:[%s2020_s4 + $0x10] sm:$0xff]  }
  0x64   :  { %629 = vmatpush1.bf16.msra.mxu0 %v1573_v28  ;;  %875 = vmatpush1.bf16.msra.mxu1 %v1576_v29  ;;  %v1640_v28 = vld [vmem:[%s2020_s4 + $0x58] sm:$0xff]  }
  0x65   :  { %630 = vmatprep.subr.bf16.mxu0 %v1581_v30  ;;  %876 = vmatprep.subr.bf16.mxu1 %v1584_v31  ;;  %v1641_v29 = vld [vmem:[%s2021_s5 + $0x18] sm:$0xff]   ;;  %v1643_v31 = vld [vmem:[%s2021_s5 + $0x60] sm:$0xff]  }
  0x66   :  { %v1642_v30 = vld [vmem:[%s2020_s4 + $0x18] sm:$0xff]  }
  0x68   :  { %631 = vmatpush1.bf16.msra.mxu0 %v1579_v32  ;;  %877 = vmatpush1.bf16.msra.mxu1 %v1582_v33  ;;  %v1644_v32 = vld [vmem:[%s2020_s4 + $0x60] sm:$0xff]  }
  0x69   :  { %632 = vmatprep.subr.bf16.mxu0 %v1587_v34  ;;  %878 = vmatprep.subr.bf16.mxu1 %v1590_v35  ;;  %v1645_v33 = vld [vmem:[%s2021_s5 + $0x20] sm:$0xff]   ;;  %v1647_v35 = vld [vmem:[%s2021_s5 + $0x68] sm:$0xff]  }
  0x6a   :  { %v1646_v34 = vld [vmem:[%s2020_s4 + $0x20] sm:$0xff]  }
  0x6c   :  { %633 = vmatpush1.bf16.msra.mxu0 %v1585_v36  ;;  %879 = vmatpush1.bf16.msra.mxu1 %v1588_v37  ;;  %v1648_v36 = vld [vmem:[%s2020_s4 + $0x68] sm:$0xff]  }
  0x6d   :  { %634 = vmatprep.subr.bf16.mxu0 %v1593_v38  ;;  %880 = vmatprep.subr.bf16.mxu1 %v1596_v39  ;;  %v1649_v37 = vld [vmem:[%s2021_s5 + $0x28] sm:$0xff]   ;;  %v1651_v39 = vld [vmem:[%s2021_s5 + $0x70] sm:$0xff]  }
  0x6e   :  { %v1650_v38 = vld [vmem:[%s2020_s4 + $0x28] sm:$0xff]  }
  0x70   :  { %635 = vmatpush1.bf16.msra.mxu0 %v1591_v40  ;;  %881 = vmatpush1.bf16.msra.mxu1 %v1594_v41  ;;  %v1652_v40 = vld [vmem:[%s2020_s4 + $0x70] sm:$0xff]  }
  0x71   :  { %636 = vmatprep.subr.bf16.mxu0 %v1599_v42  ;;  %882 = vmatprep.subr.bf16.mxu1 %v1602_v43  ;;  %v1653_v41 = vld [vmem:[%s2021_s5 + $0x30] sm:$0xff]   ;;  %v1655_v43 = vld [vmem:[%s2021_s5 + $0x78] sm:$0xff]  }
  0x72   :  { %v1654_v42 = vld [vmem:[%s2020_s4 + $0x30] sm:$0xff]  }
  0x74   :  { %637 = vmatpush1.bf16.msra.mxu0 %v1597_v44  ;;  %883 = vmatpush1.bf16.msra.mxu1 %v1600_v45  ;;  %v1656_v44 = vld [vmem:[%s2020_s4 + $0x78] sm:$0xff]  }
  0x75   :  { %638 = vmatprep.subr.bf16.mxu0 %v1605_v46  ;;  %884 = vmatprep.subr.bf16.mxu1 %v1608_v47  ;;  %v1657_v45 = vld [vmem:[%s2021_s5 + $0x38] sm:$0xff]   ;;  %v407_v47 = vld [vmem:[%s2022_s6] ss:$4 sm:$0x3] }
  0x76   :  { %v1658_v46 = vld [vmem:[%s2020_s4 + $0x38] sm:$0xff]  }
  0x78   :  { %639 = vmatpush1.bf16.msra.mxu0 %v1603_v48  ;;  %885 = vmatpush1.bf16.msra.mxu1 %v1606_v49  ;;  %v446_v48 = vsub.s32 0, %v1842_v26  ;;  %v1335_v49 = vld [vmem:[%s2022_s6 + $0x1] ss:$4 sm:$0x3] }
  0x79   :  { %640 = vmatprep.subr.bf16.mxu0 %v1611_v50  ;;  %886 = vmatprep.subr.bf16.mxu1 %v1614_v51  ;;  %v450_v50 = vsub.s32 1, %v1842_v26 }
  0x7a   :  { %v447_v51 = vrot.slane %v407_v47, %v446_v48 }
  0x7c   :  { %641 = vmatpush1.bf16.msra.mxu0 %v1609_v52  ;;  %887 = vmatpush1.bf16.msra.mxu1 %v1612_v53  ;;  %v693_v52 = vrot.slane %v1335_v49, %v446_v48  ;;  %v451_v53 = vrot.slane %v407_v47, %v450_v50 }
  0x7d   :  { %642 = vmatprep.subr.bf16.mxu0 %v1617_v54  ;;  %888 = vmatprep.subr.bf16.mxu1 %v1620_v55  ;;  %v697_v54 = vrot.slane %v1335_v49, %v450_v50 }
  0x80   :  { %643 = vmatpush1.bf16.msra.mxu0 %v1615_v56  ;;  %889 = vmatpush1.bf16.msra.mxu1 %v1618_v57 }
  0x81   :  { %644 = vmatprep.subr.bf16.mxu0 %v1623_v58  ;;  %890 = vmatprep.subr.bf16.mxu1 %v1626_v59 }
  0x84   :  { %645 = vmatpush1.bf16.msra.mxu0 %v1621_v60  ;;  %891 = vmatpush1.bf16.msra.mxu1 %v1624_v61 }
  0x85   :  { %1433 = vmatprep.subr.bf16.mxu0 %v1627_v62  ;;  %1455 = vmatprep.subr.bf16.mxu1 %v1628_v63 }
 0x11a   :  { %v347_v1 = vpop.f32.mrb[0].mxu0  ;;  %v390_v2 = vpop.f32.mrb[0].mxu1 }
 0x11b   :  { %v349_v3 = vpop.f32.mrb[1].mxu0  ;;  %v392_v4 = vpop.f32.mrb[1].mxu1 }
 0x11c   :  { %v351_v5 = vpop.f32.mrb[2].mxu0  ;;  %v394_v6 = vpop.f32.mrb[2].mxu1 }
 0x11d   :  { %v399_v7 = vpack.c.bf16 %v351_v5, %v347_v1  ;;  %v401_v8 = vpack.c.bf16 %v394_v6, %v390_v2  ;;  %v353_v9 = vpop.f32.mrb[3].mxu0  ;;  %v396_v10 = vpop.f32.mrb[3].mxu1 }
 0x11e   :  { %v400_v11 = vpack.c.bf16 %v353_v9, %v349_v3  ;;  %v402_v12 = vpack.c.bf16 %v396_v10, %v392_v4 }
 0x11f   :  { %v403_v17 = vmax.bf16 %v1711_v0, %v399_v7  ;;  %v405_v18 = vmax.bf16 %v1711_v0, %v401_v8 }
 0x120   :  { %v404_v13 = vmax.bf16 %v1711_v0, %v400_v11  ;;  %v406_v14 = vmax.bf16 %v1711_v0, %v402_v12  ;;  %v1634_v0 = vld [vmem:[%s2020_s4 + $0x8] sm:$0xff]  }
 0x122   :  { %646 = vmatprep.mubr.bf16.mxu0 %v404_v13  ;;  %892 = vmatprep.mubr.bf16.mxu1 %v406_v14 }
 0x123   :  { %647 = vmatmul.mubr.bf16.vlgmr.msra.gmra.mrb[4].mxu0 %v403_v17  ;;  %893 = vmatmul.mubr.bf16.vlgmr.msra.gmra.mrb[4].mxu1 %v405_v18 }
 0x124   :  { %1434 = vmatpush3.bf16.msra.mxu0 %v1629_v15  ;;  %1456 = vmatpush3.bf16.msra.mxu1 %v1630_v16 }
 0x125   :  { %1435 = vmatprep.subr.bf16.mxu0 %v1631_v19  ;;  %1457 = vmatprep.subr.bf16.mxu1 %v1632_v20 }
 0x128   :  { %1436 = vmatpush3.bf16.msra.mxu0 %v1633_v21  ;;  %1458 = vmatpush3.bf16.msra.mxu1 %v1634_v0 }
 0x129   :  { %1437 = vmatprep.subr.bf16.mxu0 %v1635_v22  ;;  %1459 = vmatprep.subr.bf16.mxu1 %v1636_v23 }
 0x12c   :  { %1438 = vmatpush3.bf16.msra.mxu0 %v1637_v24  ;;  %1460 = vmatpush3.bf16.msra.mxu1 %v1638_v25 }
 0x12d   :  { %1439 = vmatprep.subr.bf16.mxu0 %v1639_v27  ;;  %1461 = vmatprep.subr.bf16.mxu1 %v1640_v28  ;;  %v1432_v27 = vld [vmem:[%s2022_s6 + $0x2] ss:$0 sm:$0xff] }
 0x130   :  { %1440 = vmatpush3.bf16.msra.mxu0 %v1641_v29  ;;  %1462 = vmatpush3.bf16.msra.mxu1 %v1642_v30 }
 0x131   :  { %1441 = vmatprep.subr.bf16.mxu0 %v1643_v31  ;;  %1463 = vmatprep.subr.bf16.mxu1 %v1644_v32 }
 0x134   :  { %1442 = vmatpush3.bf16.msra.mxu0 %v1645_v33  ;;  %1464 = vmatpush3.bf16.msra.mxu1 %v1646_v34 }
 0x135   :  { %1443 = vmatprep.subr.bf16.mxu0 %v1647_v35  ;;  %1465 = vmatprep.subr.bf16.mxu1 %v1648_v36 }
 0x138   :  { %1444 = vmatpush3.bf16.msra.mxu0 %v1649_v37  ;;  %1466 = vmatpush3.bf16.msra.mxu1 %v1650_v38 }
 0x139   :  { %1445 = vmatprep.subr.bf16.mxu0 %v1651_v39  ;;  %1467 = vmatprep.subr.bf16.mxu1 %v1652_v40 }
 0x13c   :  { %1446 = vmatpush3.bf16.msra.mxu0 %v1653_v41  ;;  %1468 = vmatpush3.bf16.msra.mxu1 %v1654_v42 }
 0x13d   :  { %1447 = vmatprep.subr.bf16.mxu0 %v1655_v43  ;;  %1469 = vmatprep.subr.bf16.mxu1 %v1656_v44 }
 0x140   :  { %1448 = vmatpush3.bf16.msra.mxu0 %v1657_v45  ;;  %1470 = vmatpush3.bf16.msra.mxu1 %v1658_v46 }
 0x1f6   :  { %v648_v55 = vpop.f32.mrb[4].mxu0  ;;  %v894_v56 = vpop.f32.mrb[4].mxu1 }
 0x1f7   :  { %v649_v57 = vadd.f32 %v648_v55, %v447_v51  ;;  %v895_v58 = vadd.f32 %v894_v56, %v693_v52  ;;  %v650_v59 = vpop.f32.mrb[5].mxu0  ;;  %v896_v60 = vpop.f32.mrb[5].mxu1 }
 0x1f8   :  { %v651_v61 = vadd.f32 %v650_v59, %v451_v53  ;;  %v897_v62 = vadd.f32 %v896_v60, %v697_v54  ;;  %v652_v63 = vpop.f32.mrb[6].mxu0  ;;  %v898_v1 = vpop.f32.mrb[6].mxu1 }
 0x1f9   :  { %v653_v2 = vadd.f32 %v652_v63, %v447_v51  ;;  %v899_v3 = vadd.f32 %v898_v1, %v693_v52  ;;  %v654_v4 = vpop.f32.mrb[7].mxu0  ;;  %v900_v5 = vpop.f32.mrb[7].mxu1  ;;  %v903_v7 = vmax.f32 %v649_v57, 0.0  ;;  %v909_v8 = vmax.f32 %v895_v58, 0.0 }
 0x1fa   :  { %v655_v6 = vadd.f32 %v654_v4, %v451_v53  ;;  %v901_v26 = vadd.f32 %v900_v5, %v697_v54  ;;  %v904_v11 = vmax.f32 %v651_v61, 0.0  ;;  %v910_v12 = vmax.f32 %v897_v62, 0.0 }
 0x1fb   :  { %v905_v9 = vmax.f32 %v653_v2, 0.0  ;;  %v911_v10 = vmax.f32 %v899_v3, 0.0 }
 0x1fc   :  { %v906_v13 = vmax.f32 %v655_v6, 0.0  ;;  %v912_v14 = vmax.f32 %v901_v26, 0.0 }
 0x1fd   :  { %v907_v15 = vpack.c.bf16 %v905_v9, %v903_v7  ;;  %v913_v16 = vpack.c.bf16 %v911_v10, %v909_v8 }
 0x1fe   :  { %v908_v17 = vpack.c.bf16 %v906_v13, %v904_v11  ;;  %v914_v18 = vpack.c.bf16 %v912_v14, %v910_v12 }
 0x200   :  { %1107 = vmatprep.mubr.bf16.mxu0 %v914_v18  ;;  %1244 = vmatprep.mubr.bf16.mxu1 %v908_v17 }
 0x201   :  { %1108 = vmatmul.mubr.bf16.vlgmr.msra.gmra.mrb[8].mxu0 %v913_v16  ;;  %1245 = vmatmul.mubr.bf16.vlgmr.msra.gmra.mrb[8].mxu1 %v907_v15 }
 0x2d4   :  { %v1449_v19 = vpop.f32.mrb[8].mxu0  ;;  %v1471_v20 = vpop.f32.mrb[8].mxu1 }
 0x2d5   :  { %v1450_v21 = vpop.f32.mrb[9].mxu0  ;;  %v1472_v0 = vpop.f32.mrb[9].mxu1 }
 0x2d6   :  { %v1451_v22 = vadd.f32 %v1450_v21, %v1449_v19  ;;  %v1473_v23 = vadd.f32 %v1472_v0, %v1471_v20  ;;  %v1452_v24 = vpop.f32.mrb[10].mxu0  ;;  %v1474_v25 = vpop.f32.mrb[10].mxu1 }
 0x2d7   :  { %v1453_v28 = vpop.f32.mrb[11].mxu0  ;;  %v1475_v29 = vpop.f32.mrb[11].mxu1 }
 0x2d8   :  { %v1247_v30 = vadd.f32 %v1473_v23, %v1451_v22 }
 0x2da   :  { %v1257_v31 = vadd.f32 %v1432_v27, %v1247_v30 }
 0x2dc   :  { %1260 = vst.msk [vmem:[#allocation6] sm:$0xff] %vm1259_vm0, %v1257_v31 }
 0x2e3   :  { %v1279_v32 = vld [vmem:[#allocation6] sm:$0x3] }
 0x2e4   :  { %1280 = vst [vmem:[%s2023_s7] sm:$0x3] %v1279_v32 }
 0x2e5   :  { %1297 = vsyncpa [#allocation3], 1 }
 0x2e6   :  { %1298 = vsyncpa [#allocation5], 1 }

</bundles_post_ra>
